<compile_context>
chip_gen: v7x
topology: tpu7x:2x2x1
jax: 0.10.0
libtpu: 0.0.40
codegen_flags: <defaults>
</compile_context>

<pallas_src>
import jax
import jax.numpy as jnp
from jax.experimental import pallas as pl
from jax.experimental.pallas import tpu as pltpu


def _round_up(x, m):
    return (x + m - 1) // m * m


def _pad_to(a, shape):
    pads = tuple((0, t - s) for s, t in zip(a.shape, shape))
    if all(p == (0, 0) for p in pads):
        return a            # no-op: avoid an HBM copy when already aligned
    return jnp.pad(a, pads)


def _as_bf16(a):
    return a if a.dtype == jnp.bfloat16 else a.astype(jnp.bfloat16)


def _vmem_capacity_bytes():
    try:
        cap = getattr(pltpu.get_tpu_info(), "vmem_capacity_bytes", None)
        if cap:
            return int(cap)
    except Exception:
        pass
    # Conservative fallback: v7x has the smallest physical VMEM (64 MiB / TC).
    return 64 * 1024 * 1024


def _vmem_footprint_bytes(tm, tk, d_pad, out_bytes):
    # Double-buffered bf16 x / w1 / w2 blocks, double-buffered output block in
    # the activation dtype, plus the persistent f32 accumulator scratch:
    #   x: 2*tm*D*2, out: 2*tm*D*out_bytes, acc: tm*D*4, w1+w2: 2*(2*tk*D*2).
    return tm * d_pad * (8 + 2 * out_bytes) + 8 * tk * d_pad


def _choose_tiles(m, d_pad, inner, out_bytes):
    """Pick (tm, tk): biggest row tile that fits (-> compute-bound on the MXU),
    then biggest k tile (-> fewer grid steps / accumulator RMW passes)."""
    budget = int(_vmem_capacity_bytes() * 0.75)

    tm_cap = _round_up(m, 16)            # bf16 sublane packing wants tm % 16 == 0
    tk_cap = _round_up(inner, 128)       # lane-axis tiles are multiples of 128
    tm_opts = sorted({t for t in (1024, 768, 512, 384, 256, 128, 64, 32, 16)
                      if t < tm_cap} | {tm_cap}, reverse=True)
    tk_opts = sorted({t for t in (2048, 1024, 512, 256, 128)
                      if t < tk_cap} | {tk_cap}, reverse=True)

    for tm in tm_opts:
        for tk in tk_opts:
            if _vmem_footprint_bytes(tm, tk, d_pad, out_bytes) <= budget:
                return tm, tk
    return tm_opts[-1], tk_opts[-1]


def prepare_mlp_weights(w1_t, w2_t):
    """Pad fc1/fc2 weights (stored (in_features, out_features)) to lane
    multiples and cast to bf16 ONCE at parameter-setup time, so the per-call
    wrapper's pad/cast passes become no-ops (no per-call HBM weight copies)."""
    d, inner = w1_t.shape
    d_pad = _round_up(d, 128)
    k_pad = _round_up(inner, 128)
    w1p = _as_bf16(_pad_to(w1_t, (d_pad, k_pad)))
    w2p = _as_bf16(_pad_to(w2_t, (k_pad, d_pad)))
    return w1p, w2p


def mlp_kernel(x_ref, w1_ref, w2_ref, o_ref, acc_ref):
    # x_ref:   (tm, D_pad)   bf16  -- row tile of flattened activations
    # w1_ref:  (D_pad, tk)   bf16  -- fc1 weight (transposed), k-th column tile
    # w2_ref:  (tk, D_pad)   bf16  -- fc2 weight (transposed), k-th row tile
    # o_ref:   (tm, D_pad)   activation dtype (bf16/f32)
    # acc_ref: (tm, D_pad)   f32 scratch, persists across the inner (k) axis
    k = pl.program_id(1)

    @pl.when(k == 0)
    def _():
        acc_ref[...] = jnp.zeros_like(acc_ref)

    # fc1 partial: full contraction over D for this hidden-dim tile, f32 acc.
    h = jnp.dot(x_ref[...], w1_ref[...], preferred_element_type=jnp.float32)
    h = jnp.maximum(h, 0.0)
    h = h * h  # relu(x).square(), per (tm, tk) tile (VPU work hidden under MXU)
    # dropout(p=0.1) -> identity at inference (model.eval()).
    acc_ref[...] += jnp.dot(h.astype(w2_ref.dtype), w2_ref[...],
                            preferred_element_type=jnp.float32)

    @pl.when(k == pl.num_programs(1) - 1)
    def _():
        o_ref[...] = acc_ref[...].astype(o_ref.dtype)


def mlp_pallas(x, w1_t, w2_t, *, tm=None, tk=None, out_dtype=None):
    """x: (B, S, d_model). w1_t / w2_t are the fc1 / fc2 weights stored
    transposed, i.e. (in_features, out_features); they may be raw f32 or
    pre-padded bf16 from prepare_mlp_weights()."""
    B, S, D = x.shape
    Dw, inner = w1_t.shape
    assert w2_t.shape == (inner, Dw), (w1_t.shape, w2_t.shape)
    M = B * S

    D_pad = _round_up(max(D, Dw), 128)          # lane-dense output stores
    out_dtype = x.dtype if out_dtype is None else out_dtype
    out_bytes = jnp.dtype(out_dtype).itemsize

    if tm is None or tk is None:
        auto_tm, auto_tk = _choose_tiles(M, D_pad, inner, out_bytes)
        tm = auto_tm if tm is None else tm
        tk = auto_tk if tk is None else tk
    tm = min(tm, _round_up(M, 16))
    tk = min(tk, _round_up(inner, 128))

    M_pad = _round_up(M, tm)
    K_pad = _round_up(inner, tk)

    # Zero padding is exact: padded x columns pair with zero w1 rows, padded
    # hidden columns give h == 0 (relu^2 keeps 0) and pair with zero w2 rows,
    # padded output rows/columns are sliced off below.  Every pad/cast here is
    # a no-op when the inputs are already aligned (e.g. prepared weights).
    x2 = _as_bf16(_pad_to(x.reshape(M, D), (M_pad, D_pad)))
    w1p = _as_bf16(_pad_to(w1_t, (D_pad, K_pad)))
    w2p = _as_bf16(_pad_to(w2_t, (K_pad, D_pad)))

    cap = _vmem_capacity_bytes()
    footprint = _vmem_footprint_bytes(tm, tk, D_pad, out_bytes)
    vmem_limit = max(32 * 1024 * 1024,
                     min(int(cap * 0.85), footprint + 16 * 1024 * 1024))

    grid = (M_pad // tm, K_pad // tk)

    out = pl.pallas_call(
        mlp_kernel,
        out_shape=jax.ShapeDtypeStruct((M_pad, D_pad), out_dtype),
        grid_spec=pltpu.PrefetchScalarGridSpec(
            num_scalar_prefetch=0,
            grid=grid,
            in_specs=[
                pl.BlockSpec((tm, D_pad), lambda i, k: (i, 0)),
                pl.BlockSpec((D_pad, tk), lambda i, k: (0, k)),
                pl.BlockSpec((tk, D_pad), lambda i, k: (k, 0)),
            ],
            out_specs=pl.BlockSpec((tm, D_pad), lambda i, k: (i, 0)),
            scratch_shapes=[pltpu.VMEM((tm, D_pad), jnp.float32)],
        ),
        compiler_params=pltpu.CompilerParams(
            # M axis shards across TensorCores (v7x megacore); the reduction
            # axis feeds the accumulator so it must stay "arbitrary".
            dimension_semantics=("parallel", "arbitrary"),
            vmem_limit_bytes=int(vmem_limit),
        ),
    )(x2, w1p, w2p)

    if (M_pad, D_pad) != (M, D):
        out = out[:M, :D]
    return out.reshape(B, S, D)


def mlp_reference_bf16(x, w1_t, w2_t):
    """Same bf16-inputs / f32-accumulation numerics as the kernel."""
    B, S, D = x.shape
    xb = x.reshape(B * S, D).astype(jnp.bfloat16)
    h = jnp.dot(xb, w1_t.astype(jnp.bfloat16), preferred_element_type=jnp.float32)
    h = jnp.square(jnp.maximum(h, 0.0))
    y = jnp.dot(h.astype(jnp.bfloat16), w2_t.astype(jnp.bfloat16),
                preferred_element_type=jnp.float32)
    return y.reshape(B, S, D).astype(x.dtype)


def mlp_reference_f32(x, w1_t, w2_t):
    h = jnp.einsum("bsd,de->bse", x, w1_t)
    h = jnp.square(jnp.maximum(h, 0.0))
    return jnp.einsum("bse,ed->bsd", h, w2_t)


if __name__ == "__main__":
    key = jax.random.PRNGKey(0)
    B, S, d_model, expansion = 2, 8, 64, 4
    inner_dim = expansion * d_model  # 256

    kx, k1, k2 = jax.random.split(key, 3)
    x = jax.random.normal(kx, (B, S, d_model), dtype=jnp.float32)

    # nn.Linear(bias=False)-style init: U(-1/sqrt(fan_in), 1/sqrt(fan_in)),
    # stored transposed as (in_features, out_features).
    b1 = 1.0 / (d_model ** 0.5)
    b2 = 1.0 / (inner_dim ** 0.5)
    w1_t = jax.random.uniform(k1, (d_model, inner_dim), jnp.float32, -b1, b1)
    w2_t = jax.random.uniform(k2, (inner_dim, d_model), jnp.float32, -b2, b2)

    # 1) Auto-tiled path with raw (unpadded, f32) weights.
    y = mlp_pallas(x, w1_t, w2_t)
    jax.block_until_ready(y)
    assert y.shape == (B, S, d_model) and y.dtype == x.dtype

    # 2) Pre-padded / pre-cast weights (wrapper pads are no-ops) with a small
    #    tk so the multi-step k reduction / accumulator path is exercised.
    w1p, w2p = prepare_mlp_weights(w1_t, w2_t)
    y2 = mlp_pallas(x, w1p, w2p, tk=128)
    jax.block_until_ready(y2)
    assert y2.shape == (B, S, d_model)

    # Tight check against a reference with the same bf16-input / f32-acc path.
    y_ref_bf16 = mlp_reference_bf16(x, w1_t, w2_t)
    assert jnp.allclose(y, y_ref_bf16, atol=1e-2, rtol=1e-2)
    assert jnp.allclose(y2, y_ref_bf16, atol=1e-2, rtol=1e-2)

    # Loose sanity check against the pure-f32 reference (bf16 cast error only).
    y_ref_f32 = mlp_reference_f32(x, w1_t, w2_t)
    assert jnp.allclose(y, y_ref_f32, atol=1e-1, rtol=1e-1)

    print("KERNEL_OK")
</pallas_src>

<mosaic_0001>
module attributes {stable_mosaic.version = 11 : i64} {
  func.func @mlp_kernel(%arg0: i32, %arg1: i32, %arg2: memref<16x128xbf16, #tpu.memory_space<vmem>>, %arg3: memref<128x256xbf16, #tpu.memory_space<vmem>>, %arg4: memref<256x128xbf16, #tpu.memory_space<vmem>>, %arg5: memref<16x128xf32, #tpu.memory_space<vmem>>, %arg6: memref<16x128xf32, #tpu.memory_space<vmem>>) attributes {dimension_semantics = [#tpu.dimension_semantics<parallel>, #tpu.dimension_semantics<arbitrary>], iteration_bounds = array<i64: 1, 1>, scalar_prefetch = 0 : i64, scratch_operands = 1 : i64, tpu.core_type = #tpu.core_type<tc>, window_params = [{transform_indices = @transform_0, window_bounds = array<i64: 16, 128>}, {transform_indices = @transform_1, window_bounds = array<i64: 128, 256>}, {transform_indices = @transform_2, window_bounds = array<i64: 256, 128>}, {transform_indices = @transform_3, window_bounds = array<i64: 16, 128>}]} {
    %c0_i32 = arith.constant 0 : i32
    %0 = arith.cmpi eq, %arg1, %c0_i32 : i32
    %1 = arith.extui %0 : i1 to i32
    %c0_i32_0 = arith.constant 0 : i32
    %2 = arith.cmpi ne, %1, %c0_i32_0 : i32
    scf.if %2 {
      %cst_14 = arith.constant 0.000000e+00 : f32
      %18 = vector.broadcast %cst_14 : f32 to vector<16x128xf32>
      %c0_15 = arith.constant 0 : index
      %c0_16 = arith.constant 0 : index
      %19 = vector.load %arg6[%c0_15, %c0_16] : memref<16x128xf32, #tpu.memory_space<vmem>>, vector<16x128xf32>
      tpu.vector_store %arg6[%c0_15, %c0_16], %18 {strides = array<i32>} : memref<16x128xf32, #tpu.memory_space<vmem>>, vector<16x128xf32>,
    } else {
    }
    %c0 = arith.constant 0 : index
    %c0_1 = arith.constant 0 : index
    %3 = vector.load %arg2[%c0, %c0_1] : memref<16x128xbf16, #tpu.memory_space<vmem>>, vector<16x128xbf16>
    %c0_2 = arith.constant 0 : index
    %c0_3 = arith.constant 0 : index
    %4 = vector.load %arg3[%c0_2, %c0_3] : memref<128x256xbf16, #tpu.memory_space<vmem>>, vector<128x256xbf16>
    %cst = arith.constant dense<0.000000e+00> : vector<16x256xf32>
    %5 = tpu.matmul %3, %4, %cst {dimension_numbers = #tpu.dot_dimension_numbers<[1], [0], [0], [1], [0, 0, 1, 1], [], []>} : vector<16x128xbf16>, vector<128x256xbf16>, vector<16x256xf32> -> vector<16x256xf32>
    %cst_4 = arith.constant 0.000000e+00 : f32
    %6 = vector.broadcast %cst_4 : f32 to vector<16x256xf32>
    %7 = arith.maximumf %5, %6 : vector<16x256xf32>
    %8 = arith.mulf %7, %7 : vector<16x256xf32>
    %c0_5 = arith.constant 0 : index
    %c0_6 = arith.constant 0 : index
    %9 = vector.load %arg6[%c0_5, %c0_6] : memref<16x128xf32, #tpu.memory_space<vmem>>, vector<16x128xf32>
    %10 = arith.truncf %8 : vector<16x256xf32> to vector<16x256xbf16>
    %c0_7 = arith.constant 0 : index
    %c0_8 = arith.constant 0 : index
    %11 = vector.load %arg4[%c0_7, %c0_8] : memref<256x128xbf16, #tpu.memory_space<vmem>>, vector<256x128xbf16>
    %cst_9 = arith.constant dense<0.000000e+00> : vector<16x128xf32>
    %12 = tpu.matmul %10, %11, %cst_9 {dimension_numbers = #tpu.dot_dimension_numbers<[1], [0], [0], [1], [0, 0, 1, 1], [], []>} : vector<16x256xbf16>, vector<256x128xbf16>, vector<16x128xf32> -> vector<16x128xf32>
    %13 = arith.addf %9, %12 : vector<16x128xf32>
    %c0_10 = arith.constant 0 : index
    %c0_11 = arith.constant 0 : index
    %14 = vector.load %arg6[%c0_10, %c0_11] : memref<16x128xf32, #tpu.memory_space<vmem>>, vector<16x128xf32>
    tpu.vector_store %arg6[%c0_10, %c0_11], %13 {strides = array<i32>} : memref<16x128xf32, #tpu.memory_space<vmem>>, vector<16x128xf32>,
    %c0_i32_12 = arith.constant 0 : i32
    %15 = arith.cmpi eq, %arg1, %c0_i32_12 : i32
    %16 = arith.extui %15 : i1 to i32
    %c0_i32_13 = arith.constant 0 : i32
    %17 = arith.cmpi ne, %16, %c0_i32_13 : i32
    scf.if %17 {
      %c0_14 = arith.constant 0 : index
      %c0_15 = arith.constant 0 : index
      %18 = vector.load %arg6[%c0_14, %c0_15] : memref<16x128xf32, #tpu.memory_space<vmem>>, vector<16x128xf32>
      %c0_16 = arith.constant 0 : index
      %c0_17 = arith.constant 0 : index
      %19 = vector.load %arg5[%c0_16, %c0_17] : memref<16x128xf32, #tpu.memory_space<vmem>>, vector<16x128xf32>
      tpu.vector_store %arg5[%c0_16, %c0_17], %18 {strides = array<i32>} : memref<16x128xf32, #tpu.memory_space<vmem>>, vector<16x128xf32>,
    } else {
    }
    return
  }
  func.func @transform_0(%arg0: i32, %arg1: i32) -> (i32, i32) {
    %c0_i32 = arith.constant 0 : i32
    %c0_i32_0 = arith.constant 0 : i32
    return %arg0, %c0_i32 : i32, i32
  }
  func.func @transform_1(%arg0: i32, %arg1: i32) -> (i32, i32) {
    %c0_i32 = arith.constant 0 : i32
    %c0_i32_0 = arith.constant 0 : i32
    return %c0_i32, %arg1 : i32, i32
  }
  func.func @transform_2(%arg0: i32, %arg1: i32) -> (i32, i32) {
    %c0_i32 = arith.constant 0 : i32
    %c0_i32_0 = arith.constant 0 : i32
    return %arg1, %c0_i32 : i32, i32
  }
  func.func @transform_3(%arg0: i32, %arg1: i32) -> (i32, i32) {
    %c0_i32 = arith.constant 0 : i32
    %c0_i32_0 = arith.constant 0 : i32
    return %arg0, %c0_i32 : i32, i32
  }
}

</mosaic_0001>

<bundles_post_ra>
// kernel: tpu_custom_call.1
= control target key start
LH: loop header
LB: loop body
LE: loop exit
PB: predicated region body
PF: predicated region fallthrough
CT: control target
= control target key end

     0   :  { %8 = vsyncpa [#allocation4], 0  ;;  %s702_s0 = inlined_call_operand.hbm [shape: bf16[16,128], index: 0, kind: input, shape index: {}]   ;;  %s703_s1 = inlined_call_operand.hbm [shape: bf16[128,256], index: 1, kind: input, shape index: {}]   ;;  %s704_s2 = inlined_call_operand.hbm [shape: bf16[256,128], index: 2, kind: input, shape index: {}]   ;;  %s705_s3 = inlined_call_operand.hbm [shape: f32[16,128], index: 3, kind: output, shape index: {}]  }
   0x1   :  { %9 = vsyncpa [#allocation7], 0 }
   0x2   :  { %10 = vsyncpa [#allocation5], 0  ;;  %s619_s12 = smov [#allocation6]   ;;  %s525_s16 = scalar_lea.hbm %s703_s1, 2048 }
   0x3   :  { %s28_s13 = sshll.u32 %s619_s12, 4  ;;  %p526_p0 = scmp.ne.s32.totalorder %s703_s1, %s525_s16  ;;  %s29_s13 = int_to_ptr.vmem [resolvable:$true] %s28_s13 }
   0x4   :  { %p529_p1 = scmp.lt.u32.totalorder %s525_s16, %s703_s1 }
   0x6   :  { %p531_p2 = pnand %p529_p1, %p526_p0 }
   0x8   :  { %534 = shalt.err (!%p531_p2)
}
   0x9   :  { %s535_s21 = scalar_lea.vmem %s29_s13, 2048  ;;  %p540_p4 = scmp.lt.s32.totalorder %s29_s13, %s29_s13 }
   0xa   :  { %p536_p3 = scmp.ne.s32.totalorder %s29_s13, %s535_s21  ;;  %p541_p5 = scmp.lt.s32.totalorder %s535_s21, %s535_s21 }
   0xc   :  { %p542_p6 = por %p541_p5, %p540_p4 }
   0xe   :  { %p543_p7 = pnand %p542_p6, %p536_p3 }
  0x10   :  { %546 = shalt.err (!%p543_p7)
}
  0x11   :  { %s620_s22 = smov 128   ;;  %s621_s23 = smov 8  }
  0x12   :  { %34 = dma.hbm_to_vmem [thread:$0]  %s703_s1, 2048, %s29_s13, [#allocation7], %s620_s22, %s620_s22, %s621_s23  }
  0x13   :  { %s622_s26 = smov [#allocation3]   ;;  %s547_s30 = scalar_lea.hbm %s702_s0, 128 }
  0x14   :  { %s16_s27 = sshll.u32 %s622_s26, 4  ;;  %p548_p8 = scmp.ne.s32.totalorder %s702_s0, %s547_s30  ;;  %s17_s27 = int_to_ptr.vmem [resolvable:$true] %s16_s27 }
  0x15   :  { %p551_p9 = scmp.lt.u32.totalorder %s547_s30, %s702_s0 }
  0x17   :  { %p553_p10 = pnand %p551_p9, %p548_p8 }
  0x19   :  { %556 = shalt.err (!%p553_p10)
}
  0x1a   :  { %s557_s8 = scalar_lea.vmem %s17_s27, 128  ;;  %p562_p12 = scmp.lt.s32.totalorder %s17_s27, %s17_s27 }
  0x1b   :  { %p558_p11 = scmp.ne.s32.totalorder %s17_s27, %s557_s8  ;;  %p563_p13 = scmp.lt.s32.totalorder %s557_s8, %s557_s8 }
  0x1d   :  { %p564_p0 = por %p563_p13, %p562_p12 }
  0x1f   :  { %p565_p1 = pnand %p564_p0, %p558_p11 }
  0x21   :  { %568 = shalt.err (!%p565_p1)
}
  0x22   :  { %s623_s1 = smov 64   ;;  %s624_s9 = smov 4  }
  0x23   :  { %22 = dma.hbm_to_vmem [thread:$0]  %s702_s0, 128, %s17_s27, [#allocation4], %s623_s1, %s623_s1, %s624_s9  }
  0x24   :  { %s625_s12 = smov [#allocation8]   ;;  %s569_s16 = scalar_lea.hbm %s704_s2, 2048 }
  0x25   :  { %s40_s13 = sshll.u32 %s625_s12, 4  ;;  %p570_p2 = scmp.ne.s32.totalorder %s704_s2, %s569_s16  ;;  %s41_s13 = int_to_ptr.vmem [resolvable:$true] %s40_s13 }
  0x26   :  { %p573_p3 = scmp.lt.u32.totalorder %s569_s16, %s704_s2 }
  0x28   :  { %p575_p4 = pnand %p573_p3, %p570_p2 }
  0x2a   :  { %578 = shalt.err (!%p575_p4)
}
  0x2b   :  { %s579_s21 = scalar_lea.vmem %s41_s13, 2048  ;;  %p584_p6 = scmp.lt.s32.totalorder %s41_s13, %s41_s13 }
  0x2c   :  { %p580_p5 = scmp.ne.s32.totalorder %s41_s13, %s579_s21  ;;  %p585_p7 = scmp.lt.s32.totalorder %s579_s21, %s579_s21 }
  0x2e   :  { %p586_p8 = por %p585_p7, %p584_p6 }
  0x30   :  { %p587_p9 = pnand %p586_p8, %p580_p5 }
  0x32   :  { %590 = shalt.err (!%p587_p9)
}
  0x33   :  { %46 = dma.hbm_to_vmem [thread:$0]  %s704_s2, 2048, %s41_s13, [#allocation7], %s623_s1, %s623_s1, %s624_s9  }
  0x34   :  { %613 = dma.done.wait [#allocation4], 128  }
  0x35   :  { %614 = vsyncadd [#allocation4], 4294967168 }
  0x36   :  { %615 = dma.done.wait [#allocation7], 4096  }
  0x37   :  { %616 = vsyncadd [#allocation7], 4294963200  ;;  %v626_v0 = vmov 0   ;;  %v484_v1 = vld [vmem:[#allocation6 + $0x4] ss:$8 sps:$4 sm:$0xff]   ;;  %v513_v16 = vld [vmem:[#allocation8 + $0x50] sm:$0xff]  }
  0x38   :  { %199 = vmatprep.mubr.bf16.mxu0 %v626_v0  ;;  %v486_v2 = vld [vmem:[#allocation6] ss:$8 sps:$4 sm:$0xff]   ;;  %167 = vmatprep.subr.bf16.mxu0 %v484_v1  ;;  %v487_v3 = vld [vmem:[#allocation6 + $0x14] ss:$8 sps:$4 sm:$0xff]   ;;  %v489_v4 = vld [vmem:[#allocation6 + $0x10] ss:$8 sps:$4 sm:$0xff]  }
  0x39   :  { %168 = vmatpush1.bf16.msra.mxu0 %v486_v2  ;;  %v490_v5 = vld [vmem:[#allocation6 + $0x24] ss:$8 sps:$4 sm:$0xff]   ;;  %v492_v6 = vld [vmem:[#allocation6 + $0x20] ss:$8 sps:$4 sm:$0xff]   ;;  %v493_v7 = vld [vmem:[#allocation6 + $0x34] ss:$8 sps:$4 sm:$0xff]  }
  0x3a   :  { %169 = vmatprep.subr.bf16.mxu0 %v487_v3  ;;  %v495_v8 = vld [vmem:[#allocation6 + $0x30] ss:$8 sps:$4 sm:$0xff]   ;;  %v496_v9 = vld [vmem:[#allocation6 + $0x44] ss:$8 sps:$4 sm:$0xff]   ;;  %v498_v11 = vld [vmem:[#allocation6 + $0x40] ss:$8 sps:$4 sm:$0xff]  }
  0x3b   :  { %v509_v10 = vld [vmem:[#allocation8 + $0x40] sm:$0xff]   ;;  %v499_v13 = vld [vmem:[#allocation6 + $0x54] ss:$8 sps:$4 sm:$0xff]   ;;  %v511_v14 = vld [vmem:[#allocation8 + $0x48] sm:$0xff]   ;;  %s627_s2 = smov [#allocation9]  }
  0x3c   :  { %v510_v12 = vld [vmem:[#allocation8] sm:$0xff]   ;;  %453 = vmatprep.subr.bf16.mxu1 %v509_v10  ;;  %v512_v15 = vld [vmem:[#allocation8 + $0x8] sm:$0xff]   ;;  %v501_v17 = vld [vmem:[#allocation6 + $0x50] ss:$8 sps:$4 sm:$0xff]   ;;  %s407_s25 = sshll.u32 %s627_s2, 4  ;;  %s408_s25 = int_to_ptr.vmem [resolvable:$true] %s407_s25 }
  0x3d   :  { %170 = vmatpush1.bf16.msra.mxu0 %v489_v4  ;;  %454 = vmatpush3.bf16.msra.mxu1 %v510_v12  ;;  %v502_v18 = vld [vmem:[#allocation6 + $0x64] ss:$8 sps:$4 sm:$0xff]   ;;  %v514_v19 = vld [vmem:[#allocation8 + $0x10] sm:$0xff]   ;;  %v515_v20 = vld [vmem:[#allocation8 + $0x58] sm:$0xff]   ;;  %s591_s26 = scalar_lea.vmem %s408_s25, 256  ;;  %p596_p11 = scmp.lt.s32.totalorder %s408_s25, %s408_s25 }
  0x3e   :  { %171 = vmatprep.subr.bf16.mxu0 %v490_v5  ;;  %455 = vmatprep.subr.bf16.mxu1 %v511_v14  ;;  %v504_v21 = vld [vmem:[#allocation6 + $0x60] ss:$8 sps:$4 sm:$0xff]   ;;  %v516_v22 = vld [vmem:[#allocation8 + $0x18] sm:$0xff]   ;;  %v521_v30 = vld [vmem:[#allocation8 + $0x70] sm:$0xff]   ;;  %p592_p10 = scmp.ne.s32.totalorder %s408_s25, %s591_s26  ;;  %p597_p12 = scmp.lt.s32.totalorder %s591_s26, %s591_s26 }
  0x3f   :  { %v505_v23 = vld [vmem:[#allocation6 + $0x74] ss:$8 sps:$4 sm:$0xff]   ;;  %v517_v24 = vld [vmem:[#allocation8 + $0x60] sm:$0xff]   ;;  %v507_v25 = vld [vmem:[#allocation6 + $0x70] ss:$8 sps:$4 sm:$0xff]  }
  0x40   :  { %v518_v26 = vld [vmem:[#allocation8 + $0x20] sm:$0xff]   ;;  %v519_v27 = vld [vmem:[#allocation8 + $0x68] sm:$0xff]   ;;  %v508_v28 = vld [vmem:[#allocation3] sm:$0xff]   ;;  %p598_p13 = por %p597_p12, %p596_p11 }
  0x41   :  { %172 = vmatpush1.bf16.msra.mxu0 %v492_v6  ;;  %456 = vmatpush3.bf16.msra.mxu1 %v512_v15  ;;  %v520_v29 = vld [vmem:[#allocation8 + $0x28] sm:$0xff]   ;;  %v522_v31 = vld [vmem:[#allocation8 + $0x30] sm:$0xff]   ;;  %v523_v32 = vld [vmem:[#allocation8 + $0x78] sm:$0xff]  }
  0x42   :  { %173 = vmatprep.subr.bf16.mxu0 %v493_v7  ;;  %457 = vmatprep.subr.bf16.mxu1 %v513_v16  ;;  %v524_v33 = vld [vmem:[#allocation8 + $0x38] sm:$0xff]   ;;  %p599_p0 = pnand %p598_p13, %p592_p10 }
  0x45   :  { %174 = vmatpush1.bf16.msra.mxu0 %v495_v8  ;;  %458 = vmatpush3.bf16.msra.mxu1 %v514_v19 }
  0x46   :  { %175 = vmatprep.subr.bf16.mxu0 %v496_v9  ;;  %459 = vmatprep.subr.bf16.mxu1 %v515_v20 }
  0x49   :  { %176 = vmatpush1.bf16.msra.mxu0 %v498_v11  ;;  %460 = vmatpush3.bf16.msra.mxu1 %v516_v22 }
  0x4a   :  { %177 = vmatprep.subr.bf16.mxu0 %v499_v13  ;;  %461 = vmatprep.subr.bf16.mxu1 %v517_v24 }
  0x4d   :  { %178 = vmatpush1.bf16.msra.mxu0 %v501_v17  ;;  %462 = vmatpush3.bf16.msra.mxu1 %v518_v26 }
  0x4e   :  { %179 = vmatprep.subr.bf16.mxu0 %v502_v18  ;;  %463 = vmatprep.subr.bf16.mxu1 %v519_v27 }
  0x51   :  { %180 = vmatpush1.bf16.msra.mxu0 %v504_v21  ;;  %464 = vmatpush3.bf16.msra.mxu1 %v520_v29 }
  0x52   :  { %181 = vmatprep.subr.bf16.mxu0 %v505_v23  ;;  %465 = vmatprep.subr.bf16.mxu1 %v521_v30 }
  0x55   :  { %182 = vmatpush1.bf16.msra.mxu0 %v507_v25  ;;  %466 = vmatpush3.bf16.msra.mxu1 %v522_v31 }
  0x56   :  { %467 = vmatprep.subr.bf16.mxu1 %v523_v32 }
  0x58   :  { %200 = vmatmul.mubr.bf16.vlgmr.msra.gmra.mrb[0].mxu0 %v508_v28 }
  0x59   :  { %468 = vmatpush3.bf16.msra.mxu1 %v524_v33 }
 0x12b   :  { %v201_v34 = vpop.f32.mrb[0].mxu0 }
 0x12c   :  { %v210_v35 = vmax.f32 %v201_v34, 0.0  ;;  %v203_v36 = vpop.f32.mrb[1].mxu0 }
 0x12d   :  { %v211_v37 = vmax.f32 %v203_v36, 0.0  ;;  %v205_v38 = vpop.f32.mrb[2].mxu0 }
 0x12e   :  { %v212_v39 = vmax.f32 %v205_v38, 0.0  ;;  %v207_v40 = vpop.f32.mrb[3].mxu0  ;;  %v214_v42 = vmul.f32 %v210_v35, %v210_v35 }
 0x12f   :  { %v213_v41 = vmax.f32 %v207_v40, 0.0  ;;  %v215_v44 = vmul.f32 %v211_v37, %v211_v37 }
 0x130   :  { %v216_v43 = vmul.f32 %v212_v39, %v212_v39 }
 0x131   :  { %v217_v45 = vmul.f32 %v213_v41, %v213_v41 }
 0x132   :  { %v220_v46 = vpack.c.bf16 %v216_v43, %v214_v42 }
 0x133   :  { %v221_v47 = vpack.c.bf16 %v217_v45, %v215_v44 }
 0x135   :  { %382 = vmatprep.mubr.bf16.mxu1 %v221_v47 }
 0x136   :  { %383 = vmatmul.mubr.bf16.vlgmr.msra.gmra.mrb[0].mxu1 %v220_v46 }
 0x209   :  { %v469_v48 = vpop.f32.mrb[0].mxu1 }
 0x20a   :  { %v470_v49 = vpop.f32.mrb[1].mxu1 }
 0x20b   :  { %v471_v50 = vadd.f32 %v470_v49, %v469_v48  ;;  %v472_v51 = vpop.f32.mrb[2].mxu1 }
 0x20c   :  { %v473_v52 = vpop.f32.mrb[3].mxu1 }
 0x20d   :  { %400 = vst [vmem:[#allocation9] sm:$0xff] %v471_v50  ;;  %v474_v53 = vadd.f32 %v473_v52, %v472_v51 }
 0x20f   :  { %401 = vst [vmem:[#allocation9 + $0x8] sm:$0xff] %v474_v53 }
 0x210   :  { %602 = shalt.err (!%p599_p0)
}
 0x211   :  { %s603_s29 = scalar_lea.hbm %s705_s3, 256 }
 0x212   :  { %p604_p1 = scmp.ne.s32.totalorder %s705_s3, %s603_s29  ;;  %p607_p2 = scmp.lt.u32.totalorder %s603_s29, %s705_s3 }
 0x214   :  { %p609_p3 = pnand %p607_p2, %p604_p1 }
 0x216   :  { %612 = shalt.err (!%p609_p3)
}
 0x217   :  { %413 = dma.vmem_to_hbm [thread:$0]  %s408_s25, 256, %s705_s3, [#allocation5], %s620_s22, %s620_s22, %s621_s23  }
 0x218   :  { %617 = dma.done.wait [#allocation5], 256  }
 0x219   :  { %618 = vsyncadd [#allocation5], 4294967040 }
 0x21a   :  { %417 = vsyncpa [#allocation4], 1 }
 0x21b   :  { %418 = vsyncpa [#allocation7], 1 }
 0x21c   :  { %419 = vsyncpa [#allocation5], 1 }

</bundles_post_ra>
